<compile_context>
chip_gen: v6e
topology: v6e:2x2x1
jax: 0.10.0
libtpu: 0.0.40
codegen_flags: <defaults>
</compile_context>

<pallas_src>
import math
from functools import partial

import jax
import jax.numpy as jnp
from jax.experimental import pallas as pl
from jax.experimental.pallas import tpu as pltpu

EPS = 1e-5                      # torch.nn.InstanceNorm2d default eps
RSQRT2 = 1.0 / math.sqrt(2.0)
ACT_DTYPE = jnp.bfloat16        # inter-layer activation storage dtype


# ----------------------------- VMEM / tiling policy -----------------------------

def _detect_vmem_capacity_bytes():
    try:
        cap = int(getattr(pltpu.get_tpu_info(), "vmem_capacity_bytes", 0))
        if cap > 0:
            return cap
    except Exception:
        pass
    return 64 * 1024 * 1024     # conservative default (v7x-sized VMEM)


_VMEM_CAP = _detect_vmem_capacity_bytes()
# ~96 MiB scoped on 128 MiB parts (v5e/v6e), ~48 MiB on v7x (64 MiB physical).
_VMEM_LIMIT = min(max((_VMEM_CAP * 3) // 4, 32 * 1024 * 1024), 100 * 1024 * 1024)
_VMEM_BUDGET = (_VMEM_LIMIT * 3) // 5     # headroom for Mosaic-internal scratch


def _cparams(*sem):
    return pltpu.CompilerParams(dimension_semantics=sem, vmem_limit_bytes=_VMEM_LIMIT)


def _largest_divisor_leq(n, k):
    k = int(max(1, min(n, k)))
    while n % k:
        k -= 1
    return k


def _conv3x3_rows(H, W, cin, cout, has_res):
    """Input row-tile height: largest divisor of H whose per-step footprint fits VMEM."""
    concat = cin <= 128
    per_row = W * (
        2 * 2 * cin                                   # center input (bf16, 2 buffers)
        + 2 * 2 * cout                                # output (bf16, 2 buffers)
        + 2 * cin                                     # assembled padded tile (bf16)
        + (2 * 9 * cin if concat else 2 * 2 * cin)    # tap temporaries
        + 4 * cout                                    # f32 accumulator / epilogue
        + (2 * 2 * cout if has_res else 0)            # residual tile (bf16, 2 buffers)
    )
    fixed = 2 * (9 * cin * cout * 2) + (1 << 20)      # weights (2 buffers) + slack
    rows = max(1, min(H, max(_VMEM_BUDGET - fixed, per_row) // per_row))
    return _largest_divisor_leq(H, rows)


def _conv1x1_rows(H, W, cin, cout):
    per_row = W * (2 * 2 * cin + 2 * 2 * cout + 4 * cin + 4 * cout)
    fixed = 2 * (cin * cout * 2) + (1 << 20)
    rows = max(1, min(H, max(_VMEM_BUDGET - fixed, per_row) // per_row))
    return _largest_divisor_leq(H, rows)


# ----------------------------- fused MappingNetwork -----------------------------

def _mapping_shared_kernel(z_ref, w1, b1, w2, b2, w3, b3, w4, b4, o_ref):
    def lin(h, w, b):
        y = jnp.dot(h.astype(jnp.bfloat16), w[...],
                    preferred_element_type=jnp.float32) + b[...]
        return jnp.maximum(y, 0.0)

    h = z_ref[...]                                   # (B, latent) f32
    h = lin(h, w1, b1)
    h = lin(h, w2, b2)
    h = lin(h, w3, b3)
    h = lin(h, w4, b4)
    o_ref[...] = h


def _mapping_unshared_kernel(y_ref, h_ref, uw1, ub1, uw2, ub2, uw3, ub3, uw4, ub4,
                             o_ref):
    del y_ref  # domain selection already happened in the index_maps

    def lin(h, w, b, relu):
        y = jnp.dot(h.astype(jnp.bfloat16), w,
                    preferred_element_type=jnp.float32) + b
        return jnp.maximum(y, 0.0) if relu else y

    h = h_ref[...]                                   # (1, hidden) f32
    h = lin(h, uw1[0], ub1[0], True)
    h = lin(h, uw2[0], ub2[0], True)
    h = lin(h, uw3[0], ub3[0], True)
    h = lin(h, uw4[0], ub4[0], False)
    o_ref[...] = h


def mapping_network_forward(p, z, y_trg):
    """Shared trunk runs once for the whole batch; only the domain-selected unshared
    branch runs per sample (scalar-prefetched y_trg selects weights in index_maps)."""
    B, _ = z.shape
    hidden = p["shared"][0]["w"].shape[1]
    style_dim = p["un_w"][-1].shape[-1]

    shared_args = []
    for layer in p["shared"]:
        shared_args += [layer["w"], layer["b"]]
    h = pl.pallas_call(
        _mapping_shared_kernel,
        out_shape=jax.ShapeDtypeStruct((B, hidden), jnp.float32),
    )(z, *shared_args)

    in_specs = [pl.BlockSpec((1, hidden), lambda b, y: (b, 0))]
    args = [h]
    for wu, bu in zip(p["un_w"], p["un_b"]):
        in_specs.append(pl.BlockSpec((1,) + wu.shape[1:], lambda b, y: (y[b], 0, 0)))
        in_specs.append(pl.BlockSpec((1,) + bu.shape[1:], lambda b, y: (y[b], 0, 0)))
        args += [wu, bu]

    return pl.pallas_call(
        _mapping_unshared_kernel,
        grid_spec=pltpu.PrefetchScalarGridSpec(
            num_scalar_prefetch=1,
            grid=(B,),
            in_specs=in_specs,
            out_specs=pl.BlockSpec((1, style_dim), lambda b, y: (b, 0)),
        ),
        out_shape=jax.ShapeDtypeStruct((B, style_dim), jnp.float32),
        compiler_params=_cparams("parallel"),
    )(y_trg, *args)


# ----------------------------- 3x3 conv (halo row tiles) -----------------------------

def _conv3x3_kernel(*refs, pre_norm, has_res, want_stats, concat_taps):
    xc_ref, xt_ref, xb_ref, w_ref, b_ref = refs[:5]
    p = 5
    if pre_norm:
        sc_ref, sh_ref = refs[p:p + 2]
        p += 2
    if has_res:
        res_ref = refs[p]
        p += 1
    o_ref = refs[p]
    p += 1
    if want_stats:
        sum_ref, sq_ref = refs[p:p + 2]

    i = pl.program_id(1)
    last = pl.num_programs(1) - 1
    ts, W, Cin = xc_ref.shape[1:]
    Cout = w_ref.shape[1]

    xc = xc_ref[0].astype(jnp.float32)               # (ts, W, Cin)
    xt = xt_ref[0].astype(jnp.float32)               # (1, W, Cin) halo row above
    xb = xb_ref[0].astype(jnp.float32)               # (1, W, Cin) halo row below

    if pre_norm:
        scale = sc_ref[...]                          # (1, Cin) f32
        shift = sh_ref[...]

        def _pre(t):
            t = t * scale + shift
            return jnp.where(t >= 0.0, t, 0.2 * t)   # LeakyReLU(0.2)

        xc, xt, xb = _pre(xc), _pre(xt), _pre(xb)

    xc = xc.astype(jnp.bfloat16)
    xt = xt.astype(jnp.bfloat16)
    xb = xb.astype(jnp.bfloat16)
    # conv padding=1: rows outside the image contribute zeros (after the fused norm).
    xt = jnp.where(i > 0, xt, 0.0)
    xb = jnp.where(i < last, xb, 0.0)

    xh = jnp.concatenate([xt, xc, xb], axis=0)       # (ts+2, W, Cin)
    zc = jnp.zeros((ts + 2, 1, Cin), jnp.bfloat16)
    xp = jnp.concatenate([zc, xh, zc], axis=1)       # (ts+2, W+2, Cin) in-VMEM pad

    w = w_ref[...]                                   # (9*Cin, Cout) bf16
    if concat_taps:
        # small Cin: raise K by concatenating all 9 taps into one matmul.
        taps = [xp[dy:dy + ts, dx:dx + W, :].reshape(ts * W, Cin)
                for dy in range(3) for dx in range(3)]
        t = jnp.concatenate(taps, axis=-1)           # (ts*W, 9*Cin) bf16
        y = jnp.dot(t, w, preferred_element_type=jnp.float32)
    else:
        # large Cin: K already saturates the MXU; accumulate 9 dots (no huge temp).
        y = jnp.zeros((ts * W, Cout), jnp.float32)
        for k, (dy, dx) in enumerate((a, b) for a in range(3) for b in range(3)):
            tap = xp[dy:dy + ts, dx:dx + W, :].reshape(ts * W, Cin)
            y = y + jnp.dot(tap, w[k * Cin:(k + 1) * Cin, :],
                            preferred_element_type=jnp.float32)

    y = y + b_ref[...]
    if has_res:
        # fused residual join: (conv(x) + shortcut) * 1/sqrt(2)
        y = (y + res_ref[0].astype(jnp.float32).reshape(ts * W, Cout)) * RSQRT2

    if want_stats:
        # per-(sample, channel) sum / sum-of-squares for the *next* layer's norm.
        @pl.when(i == 0)
        def _():
            sum_ref[...] = jnp.zeros_like(sum_ref)
            sq_ref[...] = jnp.zeros_like(sq_ref)
        sum_ref[...] += jnp.sum(y, axis=0, keepdims=True)
        sq_ref[...] += jnp.sum(y * y, axis=0, keepdims=True)

    o_ref[0] = y.reshape(ts, W, Cout).astype(o_ref.dtype)


def conv3x3(x, w9, b, *, scale=None, shift=None, residual=None, want_stats=True):
    """3x3 conv, stride 1, pad 1. x:(B,H,W,Cin) bf16, w9:(9*Cin,Cout) bf16, b:(1,Cout) f32.
    scale/shift (B,Cin): fused pre-norm (x*scale+shift) + LeakyReLU(0.2).
    residual (B,H,W,Cout): epilogue (conv(x)+residual)/sqrt(2).
    want_stats: also return per-channel sum / sum-of-squares of the output."""
    B, H, W, Cin = x.shape
    Cout = w9.shape[-1]
    assert w9.shape[0] == 9 * Cin
    pre_norm = scale is not None
    has_res = residual is not None
    ts = _conv3x3_rows(H, W, Cin, Cout, has_res)
    nt = H // ts

    in_specs = [
        pl.BlockSpec((1, ts, W, Cin), lambda bi, i: (bi, i, 0, 0)),
        pl.BlockSpec((1, 1, W, Cin),
                     lambda bi, i: (bi, jnp.maximum(i * ts - 1, 0), 0, 0)),
        pl.BlockSpec((1, 1, W, Cin),
                     lambda bi, i: (bi, jnp.minimum(i * ts + ts, H - 1), 0, 0)),
        # TODO(synk): on v7x, pin constant-index weight/bias blocks to a single
        # pipeline buffer (pipeline_mode=pl.Buffered(1)) if Mosaic double-buffers them.
        pl.BlockSpec((9 * Cin, Cout), lambda bi, i: (0, 0)),
        pl.BlockSpec((1, Cout), lambda bi, i: (0, 0)),
    ]
    args = [x, x, x, w9, b]
    if pre_norm:
        in_specs += [pl.BlockSpec((1, Cin), lambda bi, i: (bi, 0))] * 2
        args += [scale, shift]
    if has_res:
        in_specs.append(pl.BlockSpec((1, ts, W, Cout), lambda bi, i: (bi, i, 0, 0)))
        args.append(residual)

    out_shape = [jax.ShapeDtypeStruct((B, H, W, Cout), ACT_DTYPE)]
    out_specs = [pl.BlockSpec((1, ts, W, Cout), lambda bi, i: (bi, i, 0, 0))]
    if want_stats:
        out_shape += [jax.ShapeDtypeStruct((B, Cout), jnp.float32)] * 2
        out_specs += [pl.BlockSpec((1, Cout), lambda bi, i: (bi, 0))] * 2

    sem = ("parallel", "arbitrary") if want_stats else ("parallel", "parallel")
    out = pl.pallas_call(
        partial(_conv3x3_kernel, pre_norm=pre_norm, has_res=has_res,
                want_stats=want_stats, concat_taps=(Cin <= 128)),
        grid=(B, nt),
        in_specs=in_specs,
        out_specs=tuple(out_specs),
        out_shape=tuple(out_shape),
        compiler_params=_cparams(*sem),
    )(*args)
    if want_stats:
        return out[0], out[1], out[2]
    return out[0]


# ----------------------------- 1x1 conv (row-tiled) -----------------------------

def _conv1x1_kernel(*refs, pre_norm):
    x_ref, w_ref, b_ref = refs[:3]
    p = 3
    if pre_norm:
        sc_ref, sh_ref = refs[p:p + 2]
        p += 2
    o_ref = refs[p]

    x = x_ref[0].astype(jnp.float32)                 # (th, W, Cin)
    th, W, Cin = x.shape
    if pre_norm:
        x = x * sc_ref[...] + sh_ref[...]
        x = jnp.where(x >= 0.0, x, 0.2 * x)
    y = jnp.dot(x.reshape(th * W, Cin).astype(jnp.bfloat16), w_ref[...],
                preferred_element_type=jnp.float32) + b_ref[...]
    o_ref[0] = y.reshape(th, W, -1).astype(o_ref.dtype)


def conv1x1(x, w, b=None, *, scale=None, shift=None, out_dtype=None):
    """1x1 conv as a row-tiled matmul. scale/shift: fused pre-norm + LeakyReLU(0.2)."""
    B, H, W, Cin = x.shape
    Cout = w.shape[-1]
    if b is None:
        b = jnp.zeros((1, Cout), jnp.float32)
    if out_dtype is None:
        out_dtype = ACT_DTYPE
    pre_norm = scale is not None
    th = _conv1x1_rows(H, W, Cin, Cout)
    nt = H // th

    in_specs = [
        pl.BlockSpec((1, th, W, Cin), lambda bi, i: (bi, i, 0, 0)),
        pl.BlockSpec((Cin, Cout), lambda bi, i: (0, 0)),
        pl.BlockSpec((1, Cout), lambda bi, i: (0, 0)),
    ]
    args = [x, w, b]
    if pre_norm:
        in_specs += [pl.BlockSpec((1, Cin), lambda bi, i: (bi, 0))] * 2
        args += [scale, shift]

    return pl.pallas_call(
        partial(_conv1x1_kernel, pre_norm=pre_norm),
        grid=(B, nt),
        in_specs=in_specs,
        out_specs=pl.BlockSpec((1, th, W, Cout), lambda bi, i: (bi, i, 0, 0)),
        out_shape=jax.ShapeDtypeStruct((B, H, W, Cout), out_dtype),
        compiler_params=_cparams("parallel", "parallel"),
    )(*args)


# ----------------------------- tiny linear (AdaIN style fc) -----------------------------

def _linear_kernel(x_ref, w_ref, b_ref, o_ref):
    o_ref[...] = jnp.dot(x_ref[...].astype(jnp.bfloat16), w_ref[...],
                         preferred_element_type=jnp.float32) + b_ref[...]


def pallas_linear(x, w, b):
    M = x.shape[0]
    Dout = w.shape[1]
    return pl.pallas_call(
        _linear_kernel,
        out_shape=jax.ShapeDtypeStruct((M, Dout), jnp.float32),
    )(x, w, b)


# ----------------------------- norm-affine glue (tiny (B,C) math) -----------------------------

def _norm_affine(s, ss, npix, gamma, beta, adain):
    """Fold InstanceNorm/AdaIN into per-channel scale/shift for the consumer conv."""
    mean = s / npix
    var = jnp.maximum(ss / npix - mean * mean, 0.0)   # biased, as in torch IN
    rstd = jax.lax.rsqrt(var + EPS)
    g = (1.0 + gamma) if adain else gamma
    scale = (g * rstd).astype(jnp.float32)
    shift = (beta - mean * g * rstd).astype(jnp.float32)
    return scale, shift


def _stats_plain(x):
    xf = x.astype(jnp.float32)
    return jnp.sum(xf, axis=(1, 2)), jnp.sum(xf * xf, axis=(1, 2))


# ----------------------------- JAX glue ops -----------------------------

def avg_pool2x2(x):           # F.avg_pool2d(x, 2)
    B, H, W, C = x.shape
    x4 = x.reshape(B, H // 2, 2, W // 2, 2, C).astype(jnp.float32)
    return x4.mean(axis=(2, 4)).astype(x.dtype)


def upsample_nearest2x(x):    # F.interpolate(x, scale_factor=2, mode='nearest')
    return jnp.repeat(jnp.repeat(x, 2, axis=1), 2, axis=2)


# ----------------------------- model forward -----------------------------

def resblk_forward(p, x, x_stats):
    B, H, W, C = x.shape
    scale1, shift1 = _norm_affine(*x_stats, H * W, p["norm1_g"], p["norm1_b"],
                                  adain=False)
    # shortcut (1x1 conv commutes exactly with 2x2 average pooling)
    sc_in = avg_pool2x2(x) if p["downsample"] else x
    sc = conv1x1(sc_in, p["conv1x1_w"]) if p["learned_sc"] else sc_in

    if p["downsample"]:
        # TODO(synk): fuse avg_pool into conv1's epilogue to save one HBM pass + the
        # extra stats read over the pooled tensor.
        h = conv3x3(x, p["conv1"]["w"], p["conv1"]["b"],
                    scale=scale1, shift=shift1, want_stats=False)
        h = avg_pool2x2(h)
        hsum, hsq = _stats_plain(h)
    else:
        h, hsum, hsq = conv3x3(x, p["conv1"]["w"], p["conv1"]["b"],
                               scale=scale1, shift=shift1)
    Hh, Wh = h.shape[1], h.shape[2]
    scale2, shift2 = _norm_affine(hsum, hsq, Hh * Wh, p["norm2_g"], p["norm2_b"],
                                  adain=False)
    out, osum, osq = conv3x3(h, p["conv2"]["w"], p["conv2"]["b"],
                             scale=scale2, shift=shift2, residual=sc)
    return out, (osum, osq)


def adain_resblk_forward(p, x, x_stats, s_style):
    B, H, W, Cin = x.shape
    g1b1 = pallas_linear(s_style, p["fc1"]["w"], p["fc1"]["b"])
    g1, b1 = jnp.split(g1b1, 2, axis=1)
    scale1, shift1 = _norm_affine(*x_stats, H * W, g1, b1, adain=True)

    if p["upsample"]:
        # TODO(synk): fuse nearest-2x into the consumer conv input tiles (in-VMEM
        # repeat) to remove this full-activation HBM pass.
        x_in = upsample_nearest2x(x)
    else:
        x_in = x
    sc = conv1x1(x_in, p["conv1x1_w"]) if p["learned_sc"] else x_in

    # AdaIN stats of x equal those of its nearest-upsampled copy, so scale1/shift1
    # (computed from x's stats) apply directly to the upsampled tensor.
    h, hsum, hsq = conv3x3(x_in, p["conv1"]["w"], p["conv1"]["b"],
                           scale=scale1, shift=shift1)
    Hh, Wh = h.shape[1], h.shape[2]
    g2b2 = pallas_linear(s_style, p["fc2"]["w"], p["fc2"]["b"])
    g2, b2 = jnp.split(g2b2, 2, axis=1)
    scale2, shift2 = _norm_affine(hsum, hsq, Hh * Wh, g2, b2, adain=True)
    # w_hpf == 0 path: conv2 epilogue fuses (residual + shortcut) / sqrt(2)
    out, osum, osq = conv3x3(h, p["conv2"]["w"], p["conv2"]["b"],
                             scale=scale2, shift=shift2, residual=sc)
    return out, (osum, osq)


def generator_forward(p, x_rgb, s):
    # RGB input: pad channels 3 -> 8 (layout friendly, zero weights on the pad).
    x = jnp.pad(x_rgb, ((0, 0), (0, 0), (0, 0), (0, 5))).astype(ACT_DTYPE)
    x, s0, ss0 = conv3x3(x, p["from_rgb"]["w"], p["from_rgb"]["b"])
    stats = (s0, ss0)
    for blk in p["encode"]:
        x, stats = resblk_forward(blk, x, stats)
    for blk in p["decode"]:
        x, stats = adain_resblk_forward(blk, x, stats, s)
    Hc, Wc = x.shape[1], x.shape[2]
    scale, shift = _norm_affine(stats[0], stats[1], Hc * Wc,
                                p["to_rgb_norm_g"], p["to_rgb_norm_b"], adain=False)
    y = conv1x1(x, p["to_rgb_conv_w"], p["to_rgb_conv_b"],
                scale=scale, shift=shift, out_dtype=jnp.float32)
    return y[..., :3]     # output channels padded 3 -> 8 at init; slice back


def latent_inference_forward(params, x_src_nchw, y_trg, z_key, latent_dim):
    B = x_src_nchw.shape[0]
    # TODO(synk): torch.randn RNG stream is not reproducible in JAX; standard-normal
    # sampling semantics are preserved via jax.random.normal.
    z = jax.random.normal(z_key, (B, latent_dim), jnp.float32)
    s = mapping_network_forward(params["mapping"], z, y_trg)
    x = jnp.transpose(x_src_nchw, (0, 2, 3, 1))      # NCHW -> NHWC
    x_fake = generator_forward(params["generator"], x, s)
    return jnp.transpose(x_fake, (0, 3, 1, 2))       # NHWC -> NCHW


# ----------------------------- deterministic init -----------------------------

def _uniform(key, shape, bound, dtype=jnp.float32):
    return jax.random.uniform(key, shape, jnp.float32, -bound, bound).astype(dtype)


def init_linear(key, din, dout):
    kw, kb = jax.random.split(key)
    bound = 1.0 / math.sqrt(din)
    return {"w": _uniform(kw, (din, dout), bound, jnp.bfloat16),
            "b": _uniform(kb, (1, dout), bound)}


def init_conv3x3(key, cin, cout, cin_pad=None):
    kw, kb = jax.random.split(key)
    bound = 1.0 / math.sqrt(cin * 9)
    w = _uniform(kw, (3, 3, cin, cout), bound)
    if cin_pad is not None and cin_pad > cin:
        w = jnp.pad(w, ((0, 0), (0, 0), (0, cin_pad - cin), (0, 0)))
        cin = cin_pad
    return {"w": w.reshape(9 * cin, cout).astype(jnp.bfloat16),
            "b": _uniform(kb, (1, cout), bound)}


def init_resblk(key, din, dout, downsample):
    k1, k2, k3 = jax.random.split(key, 3)
    p = {"downsample": downsample, "learned_sc": din != dout,
         "conv1": init_conv3x3(k1, din, din),
         "conv2": init_conv3x3(k2, din, dout),
         "norm1_g": jnp.ones((1, din), jnp.float32),
         "norm1_b": jnp.zeros((1, din), jnp.float32),
         "norm2_g": jnp.ones((1, din), jnp.float32),
         "norm2_b": jnp.zeros((1, din), jnp.float32)}
    if p["learned_sc"]:
        p["conv1x1_w"] = _uniform(k3, (din, dout), 1.0 / math.sqrt(din), jnp.bfloat16)
    return p


def init_adain_resblk(key, din, dout, style_dim, upsample):
    k1, k2, k3, k4, k5 = jax.random.split(key, 5)
    p = {"upsample": upsample, "learned_sc": din != dout,
         "conv1": init_conv3x3(k1, din, dout),
         "conv2": init_conv3x3(k2, dout, dout),
         "fc1": init_linear(k3, style_dim, 2 * din),
         "fc2": init_linear(k4, style_dim, 2 * dout)}
    if p["learned_sc"]:
        p["conv1x1_w"] = _uniform(k5, (din, dout), 1.0 / math.sqrt(din), jnp.bfloat16)
    return p


def init_generator(key, img_size, style_dim, w_hpf=0.0,
                   channel_base=2 ** 14, max_conv_dim=512):
    # TODO(synk): w_hpf > 0 high-pass / FAN-mask path not implemented (inactive:
    # LatentInferenceModel uses w_hpf=0.0 and masks=None).
    assert w_hpf == 0.0
    dim_in = channel_base // img_size
    dim_in0 = dim_in
    repeat_num = int(math.log2(img_size)) - 4
    keys = jax.random.split(key, 2 * repeat_num + 8)
    ki = iter(keys)
    p = {"from_rgb": init_conv3x3(next(ki), 3, dim_in, cin_pad=8),
         "encode": [], "decode": []}
    dim_out = dim_in
    for _ in range(repeat_num):
        dim_out = min(dim_in * 2, max_conv_dim)
        p["encode"].append(init_resblk(next(ki), dim_in, dim_out, downsample=True))
        p["decode"].insert(0, init_adain_resblk(next(ki), dim_out, dim_in,
                                                style_dim, upsample=True))
        dim_in = dim_out
    for _ in range(2):
        p["encode"].append(init_resblk(next(ki), dim_out, dim_out, downsample=False))
        p["decode"].insert(0, init_adain_resblk(next(ki), dim_out, dim_out,
                                                style_dim, upsample=False))
    p["to_rgb_norm_g"] = jnp.ones((1, dim_in0), jnp.float32)
    p["to_rgb_norm_b"] = jnp.zeros((1, dim_in0), jnp.float32)
    kw, kb = jax.random.split(next(ki))
    bound = 1.0 / math.sqrt(dim_in0)
    w_rgb = _uniform(kw, (dim_in0, 3), bound)
    b_rgb = _uniform(kb, (1, 3), bound)
    # pad output channels 3 -> 8 for a friendlier store; sliced back in the wrapper.
    p["to_rgb_conv_w"] = jnp.pad(w_rgb, ((0, 0), (0, 5))).astype(jnp.bfloat16)
    p["to_rgb_conv_b"] = jnp.pad(b_rgb, ((0, 0), (0, 5)))
    return p


def init_mapping(key, latent_dim, style_dim, num_domains, hidden_dim=512):
    keys = jax.random.split(key, 4 + num_domains * 4)
    ki = iter(keys)
    shared = [init_linear(next(ki), latent_dim, hidden_dim)]
    for _ in range(3):
        shared.append(init_linear(next(ki), hidden_dim, hidden_dim))
    branches = []
    for _ in range(num_domains):
        branch = [init_linear(next(ki), hidden_dim, hidden_dim) for _ in range(3)]
        branch.append(init_linear(next(ki), hidden_dim, style_dim))
        branches.append(branch)
    # stacked per-layer across domains for scalar-prefetch branch selection
    un_w = [jnp.stack([br[li]["w"] for br in branches]) for li in range(4)]
    un_b = [jnp.stack([br[li]["b"] for br in branches]) for li in range(4)]
    return {"shared": shared, "un_w": un_w, "un_b": un_b}


# ----------------------------- demo -----------------------------

if __name__ == "__main__":
    # Small config consistent with the module (original StarGAN-v2: img_size=256,
    # style_dim=64, latent_dim=16, channel_base=2**14, max_conv_dim=512, hidden=512;
    # scaled down here for a fast synthetic test).
    B = 2
    IMG_SIZE = 32
    STYLE_DIM = 16
    LATENT_DIM = 16
    NUM_DOMAINS = 6
    W_HPF = 0.0

    root = jax.random.PRNGKey(0)
    k_gen, k_map, k_x, k_y, k_z = jax.random.split(root, 5)

    params = {
        "generator": init_generator(k_gen, IMG_SIZE, STYLE_DIM, w_hpf=W_HPF,
                                    channel_base=2 ** 9, max_conv_dim=64),
        "mapping": init_mapping(k_map, LATENT_DIM, STYLE_DIM, NUM_DOMAINS,
                                hidden_dim=64),
    }

    x_src = jax.random.normal(k_x, (B, 3, IMG_SIZE, IMG_SIZE), jnp.float32)  # NCHW
    y_trg = jax.random.randint(k_y, (B,), 0, NUM_DOMAINS, dtype=jnp.int32)

    x_fake = latent_inference_forward(params, x_src, y_trg, k_z, LATENT_DIM)
    x_fake = jax.block_until_ready(x_fake)

    assert x_fake.shape == (B, 3, IMG_SIZE, IMG_SIZE)
    assert x_fake.dtype == jnp.float32
    assert bool(jnp.all(jnp.isfinite(x_fake)))
    print("KERNEL_OK")
</pallas_src>

<mosaic_0001>
module attributes {stable_mosaic.version = 11 : i64} {
  func.func @_mapping_shared_kernel(%arg0: memref<2x16xf32, #tpu.memory_space<vmem>>, %arg1: memref<16x64xbf16, #tpu.memory_space<vmem>>, %arg2: memref<1x64xf32, #tpu.memory_space<vmem>>, %arg3: memref<64x64xbf16, #tpu.memory_space<vmem>>, %arg4: memref<1x64xf32, #tpu.memory_space<vmem>>, %arg5: memref<64x64xbf16, #tpu.memory_space<vmem>>, %arg6: memref<1x64xf32, #tpu.memory_space<vmem>>, %arg7: memref<64x64xbf16, #tpu.memory_space<vmem>>, %arg8: memref<1x64xf32, #tpu.memory_space<vmem>>, %arg9: memref<2x64xf32, #tpu.memory_space<vmem>>) attributes {dimension_semantics = [], scalar_prefetch = 0 : i64, scratch_operands = 0 : i64, tpu.core_type = #tpu.core_type<tc>} {
    %c0 = arith.constant 0 : index
    %c0_0 = arith.constant 0 : index
    %0 = vector.load %arg0[%c0, %c0_0] : memref<2x16xf32, #tpu.memory_space<vmem>>, vector<2x16xf32>
    %1 = arith.truncf %0 : vector<2x16xf32> to vector<2x16xbf16>
    %c0_1 = arith.constant 0 : index
    %c0_2 = arith.constant 0 : index
    %2 = vector.load %arg1[%c0_1, %c0_2] : memref<16x64xbf16, #tpu.memory_space<vmem>>, vector<16x64xbf16>
    %cst = arith.constant dense<0.000000e+00> : vector<2x64xf32>
    %3 = tpu.matmul %1, %2, %cst {dimension_numbers = #tpu.dot_dimension_numbers<[1], [0], [0], [1], [0, 0, 1, 1], [], []>} : vector<2x16xbf16>, vector<16x64xbf16>, vector<2x64xf32> -> vector<2x64xf32>
    %c0_3 = arith.constant 0 : index
    %c0_4 = arith.constant 0 : index
    %4 = vector.load %arg2[%c0_3, %c0_4] : memref<1x64xf32, #tpu.memory_space<vmem>>, vector<1x64xf32>
    %5 = vector.broadcast %4 : vector<1x64xf32> to vector<2x64xf32>
    %6 = arith.addf %3, %5 : vector<2x64xf32>
    %cst_5 = arith.constant 0.000000e+00 : f32
    %7 = vector.broadcast %cst_5 : f32 to vector<2x64xf32>
    %8 = arith.maximumf %6, %7 : vector<2x64xf32>
    %9 = arith.truncf %8 : vector<2x64xf32> to vector<2x64xbf16>
    %c0_6 = arith.constant 0 : index
    %c0_7 = arith.constant 0 : index
    %10 = vector.load %arg3[%c0_6, %c0_7] : memref<64x64xbf16, #tpu.memory_space<vmem>>, vector<64x64xbf16>
    %cst_8 = arith.constant dense<0.000000e+00> : vector<2x64xf32>
    %11 = tpu.matmul %9, %10, %cst_8 {dimension_numbers = #tpu.dot_dimension_numbers<[1], [0], [0], [1], [0, 0, 1, 1], [], []>} : vector<2x64xbf16>, vector<64x64xbf16>, vector<2x64xf32> -> vector<2x64xf32>
    %c0_9 = arith.constant 0 : index
    %c0_10 = arith.constant 0 : index
    %12 = vector.load %arg4[%c0_9, %c0_10] : memref<1x64xf32, #tpu.memory_space<vmem>>, vector<1x64xf32>
    %13 = vector.broadcast %12 : vector<1x64xf32> to vector<2x64xf32>
    %14 = arith.addf %11, %13 : vector<2x64xf32>
    %cst_11 = arith.constant 0.000000e+00 : f32
    %15 = vector.broadcast %cst_11 : f32 to vector<2x64xf32>
    %16 = arith.maximumf %14, %15 : vector<2x64xf32>
    %17 = arith.truncf %16 : vector<2x64xf32> to vector<2x64xbf16>
    %c0_12 = arith.constant 0 : index
    %c0_13 = arith.constant 0 : index
    %18 = vector.load %arg5[%c0_12, %c0_13] : memref<64x64xbf16, #tpu.memory_space<vmem>>, vector<64x64xbf16>
    %cst_14 = arith.constant dense<0.000000e+00> : vector<2x64xf32>
    %19 = tpu.matmul %17, %18, %cst_14 {dimension_numbers = #tpu.dot_dimension_numbers<[1], [0], [0], [1], [0, 0, 1, 1], [], []>} : vector<2x64xbf16>, vector<64x64xbf16>, vector<2x64xf32> -> vector<2x64xf32>
    %c0_15 = arith.constant 0 : index
    %c0_16 = arith.constant 0 : index
    %20 = vector.load %arg6[%c0_15, %c0_16] : memref<1x64xf32, #tpu.memory_space<vmem>>, vector<1x64xf32>
    %21 = vector.broadcast %20 : vector<1x64xf32> to vector<2x64xf32>
    %22 = arith.addf %19, %21 : vector<2x64xf32>
    %cst_17 = arith.constant 0.000000e+00 : f32
    %23 = vector.broadcast %cst_17 : f32 to vector<2x64xf32>
    %24 = arith.maximumf %22, %23 : vector<2x64xf32>
    %25 = arith.truncf %24 : vector<2x64xf32> to vector<2x64xbf16>
    %c0_18 = arith.constant 0 : index
    %c0_19 = arith.constant 0 : index
    %26 = vector.load %arg7[%c0_18, %c0_19] : memref<64x64xbf16, #tpu.memory_space<vmem>>, vector<64x64xbf16>
    %cst_20 = arith.constant dense<0.000000e+00> : vector<2x64xf32>
    %27 = tpu.matmul %25, %26, %cst_20 {dimension_numbers = #tpu.dot_dimension_numbers<[1], [0], [0], [1], [0, 0, 1, 1], [], []>} : vector<2x64xbf16>, vector<64x64xbf16>, vector<2x64xf32> -> vector<2x64xf32>
    %c0_21 = arith.constant 0 : index
    %c0_22 = arith.constant 0 : index
    %28 = vector.load %arg8[%c0_21, %c0_22] : memref<1x64xf32, #tpu.memory_space<vmem>>, vector<1x64xf32>
    %29 = vector.broadcast %28 : vector<1x64xf32> to vector<2x64xf32>
    %30 = arith.addf %27, %29 : vector<2x64xf32>
    %cst_23 = arith.constant 0.000000e+00 : f32
    %31 = vector.broadcast %cst_23 : f32 to vector<2x64xf32>
    %32 = arith.maximumf %30, %31 : vector<2x64xf32>
    %c0_24 = arith.constant 0 : index
    %c0_25 = arith.constant 0 : index
    %33 = vector.load %arg9[%c0_24, %c0_25] : memref<2x64xf32, #tpu.memory_space<vmem>>, vector<2x64xf32>
    tpu.vector_store %arg9[%c0_24, %c0_25], %32 {strides = array<i32>} : memref<2x64xf32, #tpu.memory_space<vmem>>, vector<2x64xf32>,
    return
  }
}

</mosaic_0001>

<bundles_post_ra>
// kernel: tpu_custom_call.1
= control target key start
LH: loop header
LB: loop body
LE: loop exit
PB: predicated region body
PF: predicated region fallthrough
CT: control target
= control target key end

     0   :  { %14 = vsyncpa [#allocation3], 0  ;;  %s791_s0 = inlined_call_operand.hbm [shape: f32[2,16], index: 0, kind: input, shape index: {}]   ;;  %s792_s1 = inlined_call_operand.hbm [shape: bf16[16,64], index: 1, kind: input, shape index: {}]   ;;  %s793_s2 = inlined_call_operand.vmem [shape: f32[1,64], index: 2, kind: input, shape index: {}]   ;;  %s794_s3 = inlined_call_operand.hbm [shape: bf16[64,64], index: 3, kind: input, shape index: {}]   ;;  %s795_s4 = inlined_call_operand.vmem [shape: f32[1,64], index: 4, kind: input, shape index: {}]   ;;  %s796_s5 = inlined_call_operand.hbm [shape: bf16[64,64], index: 5, kind: input, shape index: {}]   ;;  %s797_s6 = inlined_call_operand.vmem [shape: f32[1,64], index: 6, kind: input, shape index: {}]   ;;  %s798_s7 = inlined_call_operand.hbm [shape: bf16[64,64], index: 7, kind: input, shape index: {}]   ;;  %s799_s8 = inlined_call_operand.vmem [shape: f32[1,64], index: 8, kind: input, shape index: {}]   ;;  %s800_s9 = inlined_call_operand.hbm [shape: f32[2,64], index: 9, kind: output, shape index: {}]  }
   0x1   :  { %15 = vsyncpa [#allocation6], 0 }
   0x2   :  { %16 = vsyncpa [#allocation9], 0 }
   0x3   :  { %17 = vsyncpa [#allocation4], 0  ;;  %s665_s30 = smov [#allocation5]  }
   0x4   :  { %s33_s10 = sshll.u32 %s665_s30, 4  ;;  %s34_s10 = int_to_ptr.vmem [resolvable:$true] %s33_s10 }
   0x5   :  { %s545_s11 = scalar_lea.vmem %s34_s10, 128  ;;  %p550_p1 = scmp.lt.s32.totalorder %s34_s10, %s34_s10 }
   0x6   :  { %p546_p0 = scmp.ne.s32.totalorder %s34_s10, %s545_s11  ;;  %p551_p2 = scmp.lt.s32.totalorder %s545_s11, %s545_s11 }
   0x8   :  { %p552_p3 = por %p551_p2, %p550_p1 }
   0xa   :  { %p553_p4 = pnand %p552_p3, %p546_p0 }
   0xc   :  { %556 = shalt.err (!%p553_p4)
}
   0xd   :  { %s666_s12 = smov 64   ;;  %s667_s13 = smov 4  }
   0xe   :  { %39 = dma.hbm_to_vmem [thread:$0]  %s792_s1, 128, %s34_s10, [#allocation6], %s666_s12, %s666_s12, %s667_s13  }
   0xf   :  { %s668_s16 = smov [#allocation8]   ;;  %s669_s18 = smov [#allocation2]  }
  0x10   :  { %s61_s17 = sshll.u32 %s668_s16, 4  ;;  %s24_s19 = sshll.u32 %s669_s18, 4  ;;  %s62_s17 = int_to_ptr.vmem [resolvable:$true] %s61_s17  ;;  %s25_s19 = int_to_ptr.vmem [resolvable:$true] %s24_s19 }
  0x11   :  { %s565_s20 = scalar_lea.vmem %s62_s17, 512  ;;  %p570_p6 = scmp.lt.s32.totalorder %s62_s17, %s62_s17 }
  0x12   :  { %p566_p5 = scmp.ne.s32.totalorder %s62_s17, %s565_s20  ;;  %p571_p7 = scmp.lt.s32.totalorder %s565_s20, %s565_s20 }
  0x14   :  { %p572_p8 = por %p571_p7, %p570_p6 }
  0x16   :  { %p573_p9 = pnand %p572_p8, %p566_p5 }
  0x18   :  { %576 = shalt.err (!%p573_p9)
}
  0x19   :  { %67 = dma.hbm_to_vmem [thread:$0]  %s796_s5, 512, %s62_s17, [#allocation9], %s666_s12, %s666_s12, %s667_s13  }
  0x1a   :  { %s585_s1 = scalar_lea.vmem %s25_s19, 32  ;;  %p590_p11 = scmp.lt.s32.totalorder %s25_s19, %s25_s19 }
  0x1b   :  { %p586_p10 = scmp.ne.s32.totalorder %s25_s19, %s585_s1  ;;  %p591_p12 = scmp.lt.s32.totalorder %s585_s1, %s585_s1 }
  0x1d   :  { %p592_p13 = por %p591_p12, %p590_p11 }
  0x1f   :  { %p593_p0 = pnand %p592_p13, %p586_p10 }
  0x21   :  { %596 = shalt.err (!%p593_p0)
}
  0x22   :  { %27 = dma.hbm_to_vmem [thread:$0]  %s791_s0, 32, %s25_s19, [#allocation3]  }
  0x23   :  { %s670_s25 = smov [#allocation7]   ;;  %s671_s27 = smov [#allocation10]  }
  0x24   :  { %s47_s26 = sshll.u32 %s670_s25, 4  ;;  %s75_s28 = sshll.u32 %s671_s27, 4  ;;  %s48_s26 = int_to_ptr.vmem [resolvable:$true] %s47_s26  ;;  %s76_s28 = int_to_ptr.vmem [resolvable:$true] %s75_s28 }
  0x25   :  { %s605_s29 = scalar_lea.vmem %s48_s26, 512  ;;  %p610_p2 = scmp.lt.s32.totalorder %s48_s26, %s48_s26 }
  0x26   :  { %p606_p1 = scmp.ne.s32.totalorder %s48_s26, %s605_s29  ;;  %p611_p3 = scmp.lt.s32.totalorder %s605_s29, %s605_s29 }
  0x28   :  { %p612_p4 = por %p611_p3, %p610_p2 }
  0x2a   :  { %p613_p5 = pnand %p612_p4, %p606_p1 }
  0x2c   :  { %616 = shalt.err (!%p613_p5)
}
  0x2d   :  { %53 = dma.hbm_to_vmem [thread:$0]  %s794_s3, 512, %s48_s26, [#allocation6], %s666_s12, %s666_s12, %s667_s13  }
  0x2e   :  { %s625_s0 = scalar_lea.vmem %s76_s28, 512  ;;  %p630_p7 = scmp.lt.s32.totalorder %s76_s28, %s76_s28 }
  0x2f   :  { %p626_p6 = scmp.ne.s32.totalorder %s76_s28, %s625_s0  ;;  %p631_p8 = scmp.lt.s32.totalorder %s625_s0, %s625_s0 }
  0x31   :  { %p632_p9 = por %p631_p8, %p630_p7 }
  0x33   :  { %p633_p10 = pnand %p632_p9, %p626_p6 }
  0x35   :  { %636 = shalt.err (!%p633_p10)
}
  0x36   :  { %81 = dma.hbm_to_vmem [thread:$0]  %s798_s7, 512, %s76_s28, [#allocation9], %s666_s12, %s666_s12, %s667_s13  }
  0x37   :  { %657 = dma.done.wait [#allocation3], 32  }
  0x38   :  { %658 = vsyncadd [#allocation3], 4294967264 }
  0x39   :  { %659 = dma.done.wait [#allocation6], 640  }
  0x3a   :  { %660 = vsyncadd [#allocation6], 4294966656 }
  0x3b   :  { %661 = dma.done.wait [#allocation9], 1024  }
  0x3c   :  { %662 = vsyncadd [#allocation9], 4294966272  ;;  %v672_v0 = vmov 0.0   ;;  %vm673_vm0 = vmmov 0   ;;  %v524_v1 = vld [vmem:[#allocation5] sm:$0xff]   ;;  %vm117_vm1 = vcmask 130048  }
  0x3d   :  { %472 = vmatprep.subr.bf16.mxu0 %v672_v0  ;;  %474 = vmatprep.mubr.msk.bf16.mxu0 %vm673_vm0, %v672_v0  ;;  %v100_v2 = vld [vmem:[#allocation2] sm:$0x3]  ;;  %v525_v4 = vld [vmem:[#allocation7 + $0x18] sm:$0xff]   ;;  %v527_v6 = vld [vmem:[#allocation7 + $0x8] sm:$0xff]   ;;  %vm202_vm2 = vcmask 523264   ;;  %s674_s16 = smov [#allocation11]  }
  0x3e   :  { %478 = vmatprep.subr.bf16.mxu1 %v672_v0  ;;  %486 = vmatprep.mubr.msk.bf16.mxu1 %vm673_vm0, %v672_v0  ;;  %v101_v3 = vpack.c.bf16 %v100_v2, %v100_v2  ;;  %v526_v5 = vld [vmem:[#allocation7 + $0x10] sm:$0xff]   ;;  %v528_v7 = vld [vmem:[#allocation7] sm:$0xff]   ;;  %v529_v8 = vld [vmem:[#allocation8 + $0x18] sm:$0xff]   ;;  %s423_s17 = sshll.u32 %s674_s16, 4  ;;  %vm415_vm3 = vcmask 517120   ;;  %s424_s17 = int_to_ptr.vmem [resolvable:$true] %s423_s17 }
  0x3f   :  { %473 = vmatpush3.bf16.msra.mxu0 %v524_v1  ;;  %479 = vmatpush3.bf16.msra.mxu1 %v525_v4  ;;  %v530_v9 = vld [vmem:[#allocation8 + $0x10] sm:$0xff]   ;;  %v531_v18 = vld [vmem:[#allocation8 + $0x8] sm:$0xff]   ;;  %v532_v19 = vld [vmem:[#allocation8] sm:$0xff]   ;;  %p642_p12 = scmp.lt.s32.totalorder %s424_s17, %s424_s17 }
  0x40   :  { %490 = vmatprep.subr.bf16.mxu0 %v672_v0  ;;  %480 = vmatprep.subr.bf16.mxu1 %v672_v0  ;;  %v434_v10 = vld [vmem:[%s793_s2] ss:$0 sm:$0xff]  ;;  %v533_v20 = vld [vmem:[#allocation10 + $0x18] sm:$0xff]   ;;  %v535_v30 = vld [vmem:[#allocation10 + $0x8] sm:$0xff]  }
  0x41   :  { %v534_v21 = vld [vmem:[#allocation10 + $0x10] sm:$0xff]   ;;  %v536_v31 = vld [vmem:[#allocation10] sm:$0xff]  }
  0x42   :  { %475 = vmatmul.mubr.msk.bf16.vlgmr.msra.gmra.mxu0 %vm117_vm1, %v101_v3  ;;  %v437_v22 = vld [vmem:[%s795_s4] ss:$0 sm:$0xff] }
  0x43   :  { %498 = vmatprep.mubr.msk.bf16.mxu0 %vm673_vm0, %v672_v0  ;;  %481 = vmatpush3.bf16.msra.mxu1 %v526_v5  ;;  %v443_v32 = vld [vmem:[%s797_s6] ss:$0 sm:$0xff]  ;;  %s637_s6 = scalar_lea.vmem %s424_s17, 32 }
  0x44   :  { %482 = vmatprep.subr.bf16.mxu1 %v672_v0  ;;  %491 = vmatpush3.bf16.msra.mxu0 %v529_v8  ;;  %v449_v40 = vld [vmem:[%s799_s8] ss:$0 sm:$0xff]  ;;  %p638_p11 = scmp.ne.s32.totalorder %s424_s17, %s637_s6  ;;  %p643_p13 = scmp.lt.s32.totalorder %s637_s6, %s637_s6 }
  0x45   :  { %492 = vmatprep.subr.bf16.mxu0 %v672_v0 }
  0x46   :  { %p644_p0 = por %p643_p13, %p642_p12 }
  0x47   :  { %483 = vmatpush3.bf16.msra.mxu1 %v527_v6 }
  0x48   :  { %484 = vmatprep.subr.bf16.mxu1 %v672_v0  ;;  %493 = vmatpush3.bf16.msra.mxu0 %v530_v9  ;;  %p645_p1 = pnand %p644_p0, %p638_p11 }
  0x49   :  { %494 = vmatprep.subr.bf16.mxu0 %v672_v0 }
  0x4b   :  { %485 = vmatpush3.bf16.msra.mxu1 %v528_v7 }
  0x4c   :  { %502 = vmatprep.subr.bf16.mxu1 %v672_v0  ;;  %495 = vmatpush3.bf16.msra.mxu0 %v531_v18 }
  0x4d   :  { %496 = vmatprep.subr.bf16.mxu0 %v672_v0 }
  0x50   :  { %497 = vmatpush3.bf16.msra.mxu0 %v532_v19 }
 0x102   :  { %v155_v11 = vpop.f32.mrf.mxu0 }
 0x103   :  { %v156_v12 = vadd.f32 %v434_v10, %v155_v11 }
 0x104   :  { %v476_v13 = vpop.f32.mrf.mxu0 }
 0x105   :  { %v161_v14 = vmax.f32 %v156_v12, 0.0 }
 0x106   :  { %v158_v15 = vpop.f32.mrf.mxu0 }
 0x107   :  { %v162_v16 = vpack.c.bf16 %v161_v14, %v161_v14 }
 0x108   :  { %v477_v17 = vpop.f32.mrf.mxu0 }
 0x109   :  { %487 = vmatmul.mubr.msk.bf16.vlgmr.msra.gmra.mxu1 %vm202_vm2, %v162_v16 }
 0x10a   :  { %510 = vmatprep.mubr.msk.bf16.mxu1 %vm673_vm0, %v672_v0  ;;  %503 = vmatpush3.bf16.msra.mxu1 %v533_v20 }
 0x10b   :  { %504 = vmatprep.subr.bf16.mxu1 %v672_v0 }
 0x10e   :  { %505 = vmatpush3.bf16.msra.mxu1 %v534_v21 }
 0x10f   :  { %506 = vmatprep.subr.bf16.mxu1 %v672_v0 }
 0x112   :  { %507 = vmatpush3.bf16.msra.mxu1 %v535_v30 }
 0x113   :  { %508 = vmatprep.subr.bf16.mxu1 %v672_v0 }
 0x116   :  { %509 = vmatpush3.bf16.msra.mxu1 %v536_v31 }
 0x1c9   :  { %v240_v23 = vpop.f32.mrf.mxu1 }
 0x1ca   :  { %v241_v24 = vadd.f32 %v437_v22, %v240_v23 }
 0x1cb   :  { %v488_v25 = vpop.f32.mrf.mxu1 }
 0x1cc   :  { %v246_v26 = vmax.f32 %v241_v24, 0.0 }
 0x1cd   :  { %v243_v27 = vpop.f32.mrf.mxu1 }
 0x1ce   :  { %v247_v28 = vpack.c.bf16 %v246_v26, %v246_v26 }
 0x1cf   :  { %v489_v29 = vpop.f32.mrf.mxu1 }
 0x1d0   :  { %499 = vmatmul.mubr.msk.bf16.vlgmr.msra.gmra.mxu0 %vm202_vm2, %v247_v28 }
 0x290   :  { %v324_v33 = vpop.f32.mrf.mxu0 }
 0x291   :  { %v325_v34 = vadd.f32 %v443_v32, %v324_v33 }
 0x292   :  { %v500_v35 = vpop.f32.mrf.mxu0 }
 0x293   :  { %v330_v36 = vmax.f32 %v325_v34, 0.0 }
 0x294   :  { %v327_v37 = vpop.f32.mrf.mxu0 }
 0x295   :  { %v331_v38 = vpack.c.bf16 %v330_v36, %v330_v36 }
 0x296   :  { %v501_v39 = vpop.f32.mrf.mxu0 }
 0x297   :  { %511 = vmatmul.mubr.msk.bf16.vlgmr.msra.gmra.mxu1 %vm202_vm2, %v331_v38 }
 0x357   :  { %v408_v41 = vpop.f32.mrf.mxu1 }
 0x358   :  { %v409_v42 = vadd.f32 %v449_v40, %v408_v41 }
 0x359   :  { %v512_v43 = vpop.f32.mrf.mxu1 }
 0x35a   :  { %v414_v44 = vmax.f32 %v409_v42, 0.0 }
 0x35b   :  { %v411_v45 = vpop.f32.mrf.mxu1 }
 0x35c   :  { %416 = vst.msk [vmem:[#allocation11] sm:$0x3] %vm415_vm3, %v414_v44 }
 0x35d   :  { %v513_v46 = vpop.f32.mrf.mxu1 }
 0x35e   :  { %648 = shalt.err (!%p645_p1)
}
 0x35f   :  { %426 = dma.vmem_to_hbm [thread:$0]  %s424_s17, 32, %s800_s9, [#allocation4]  }
 0x360   :  { %663 = dma.done.wait [#allocation4], 32  }
 0x361   :  { %664 = vsyncadd [#allocation4], 4294967264 }
 0x362   :  { %430 = vsyncpa [#allocation3], 1 }
 0x363   :  { %431 = vsyncpa [#allocation6], 1 }
 0x364   :  { %432 = vsyncpa [#allocation9], 1 }
 0x365   :  { %433 = vsyncpa [#allocation4], 1 }

</bundles_post_ra>
